<compile_context>
chip_gen: v7x
topology: tpu7x:2x2x1
jax: 0.10.0
libtpu: 0.0.40
codegen_flags: <defaults>
</compile_context>

<pallas_src>
import jax
import jax.numpy as jnp
import numpy as np
from jax.experimental import pallas as pl
from jax.experimental.pallas import tpu as pltpu


def ensemble_kernel(wts_ref, x_ref, w_ref, b_ref, o_ref, acc_ref):
    """One (Dout-tile n, model m, Din-tile k) grid step.

    wts_ref : (M,)        f32 SMEM (scalar-prefetched), already carries 1/M
    x_ref   : (B,  tk)    MXU dtype, VMEM
    w_ref   : (1, tk, tn) MXU dtype, VMEM   (block (m, k, n) of stacked W)
    b_ref   : (1, tn)     f32 VMEM          (pre-reduced effective bias)
    o_ref   : (B,  tn)    output dtype
    acc_ref : (B,  tn)    f32 VMEM accumulator (lives across the m, k axes)
    """
    m = pl.program_id(1)
    k = pl.program_id(2)

    @pl.when((m == 0) & (k == 0))
    def _init():
        acc_ref[...] = jnp.zeros_like(acc_ref)

    # Narrow-dtype MXU inputs, f32 accumulation; the per-model ensemble weight
    # scales the f32 partial on the VPU so the dot inputs keep the MXU dtype.
    part = jnp.dot(x_ref[...], w_ref[0], preferred_element_type=jnp.float32)
    acc_ref[...] += wts_ref[m] * part

    @pl.when((m == pl.num_programs(1) - 1) & (k == pl.num_programs(2) - 1))
    def _finalize():
        o_ref[...] = (acc_ref[...] + b_ref[...]).astype(o_ref.dtype)


def ensemble_forward(x, W, b, weights, *, tn=256, tk=128, mxu_dtype=jnp.bfloat16):
    """x:(B,Din)  W:(M,Din,Dout)  b:(M,Dout)  weights:(M,) -> (B,Dout)."""
    M, D_in, D_out = W.shape
    B = x.shape[0]
    tn = min(tn, D_out)
    tk = min(tk, D_in)
    assert D_out % tn == 0 and D_in % tk == 0, "wrapper assumes divisible tiles"

    # Fold the 1/M mean into the ensemble weights; pre-reduce the bias.
    wts = weights.astype(jnp.float32) / jnp.float32(M)
    b_eff = jnp.sum(wts[:, None] * b.astype(jnp.float32), axis=0, keepdims=True)

    x_s = x.astype(mxu_dtype)
    W_s = W.astype(mxu_dtype)

    grid = (D_out // tn, M, D_in // tk)  # reduction axes (m, k) last

    in_itemsize = np.dtype(mxu_dtype).itemsize
    cost = pl.CostEstimate(
        flops=2 * B * M * D_in * D_out,
        transcendentals=0,
        bytes_accessed=(M * D_in * D_out + B * D_in) * in_itemsize
        + D_out * 4
        + B * D_out * np.dtype(x.dtype).itemsize,
    )

    return pl.pallas_call(
        ensemble_kernel,
        out_shape=jax.ShapeDtypeStruct((B, D_out), x.dtype),
        grid_spec=pltpu.PrefetchScalarGridSpec(
            num_scalar_prefetch=1,  # ensemble weights land in SMEM
            grid=grid,
            in_specs=[
                # TODO(synk): also tile B once callers batch >=128 rows; at
                # B=8 the kernel is weight-stream bound so x stays one block.
                pl.BlockSpec((B, tk), lambda n, m, k, wts: (0, k)),          # x
                pl.BlockSpec((1, tk, tn), lambda n, m, k, wts: (m, k, n)),   # W[m]
                pl.BlockSpec((1, tn), lambda n, m, k, wts: (0, n)),          # b_eff
            ],
            out_specs=pl.BlockSpec((B, tn), lambda n, m, k, wts: (0, n)),
            scratch_shapes=[pltpu.VMEM((B, tn), jnp.float32)],
        ),
        compiler_params=pltpu.CompilerParams(
            dimension_semantics=("parallel", "arbitrary", "arbitrary"),
            vmem_limit_bytes=32 * 1024 * 1024,
        ),
        cost_estimate=cost,
    )(wts, x_s, W_s, b_eff)


def collapse_ensemble(W, b, weights):
    """Inference-time collapse (ensemble weights fixed across calls):
    W_eff = sum_m (w_m/M) W_m, b_eff = sum_m (w_m/M) b_m.  Run ONCE outside the
    per-call path; the per-call kernel then sees M=1 -> M x less weight HBM
    traffic and FLOPs."""
    M = W.shape[0]
    wts = weights.astype(jnp.float32) / jnp.float32(M)
    W_eff = jnp.einsum("m,mio->io", wts, W.astype(jnp.float32))
    b_eff = jnp.einsum("m,mo->o", wts, b.astype(jnp.float32))
    return W_eff[None].astype(W.dtype), b_eff[None], jnp.ones((1,), jnp.float32)


if __name__ == "__main__":
    key = jax.random.PRNGKey(0)
    k_x, k_w, k_b, k_wt = jax.random.split(key, 4)

    M, B, D_in, D_out = 3, 8, 256, 512

    x = jax.random.normal(k_x, (B, D_in), dtype=jnp.float32)
    W = jax.random.normal(k_w, (M, D_in, D_out), dtype=jnp.float32) * 0.05
    b = jax.random.normal(k_b, (M, D_out), dtype=jnp.float32) * 0.1
    ens_weights = jax.random.uniform(k_wt, (M,), dtype=jnp.float32) + 0.5

    # Pure-JAX reference matching PyTorch Ensemble semantics exactly.
    stacked = jnp.stack([x @ W[m] + b[m] for m in range(M)], axis=0)
    ref = jnp.mean(ens_weights.reshape(-1, 1, 1) * stacked, axis=0)

    # 1) Per-call ensemble weights, f32 MXU inputs (strict numerical check).
    out_f32 = jax.block_until_ready(
        ensemble_forward(x, W, b, ens_weights, mxu_dtype=jnp.float32))
    assert out_f32.shape == (B, D_out)
    assert jnp.allclose(out_f32, ref, atol=1e-4, rtol=1e-4), "f32 path mismatch"

    # 2) Per-call ensemble weights, bf16 weight/activation streams (production
    #    default per the perf review; f32 accumulation, looser tolerance).
    out_bf16 = jax.block_until_ready(ensemble_forward(x, W, b, ens_weights))
    assert jnp.allclose(out_bf16, ref, atol=3e-2, rtol=3e-2), "bf16 path mismatch"

    # 3) Collapsed path (weights fixed at inference): same kernel, M=1.
    W_eff, b_eff, one = collapse_ensemble(W, b, ens_weights)
    out_coll = jax.block_until_ready(
        ensemble_forward(x, W_eff, b_eff, one, mxu_dtype=jnp.float32))
    assert jnp.allclose(out_coll, ref, atol=1e-4, rtol=1e-4), "collapsed path mismatch"

    print("KERNEL_OK")
</pallas_src>

<mosaic_0001>
module attributes {stable_mosaic.version = 11 : i64} {
  func.func @ensemble_kernel(%arg0: i32, %arg1: i32, %arg2: i32, %arg3: memref<3xf32, #tpu.memory_space<smem>>, %arg4: memref<8x128xf32, #tpu.memory_space<vmem>>, %arg5: memref<1x128x256xf32, #tpu.memory_space<vmem>>, %arg6: memref<1x256xf32, #tpu.memory_space<vmem>>, %arg7: memref<8x256xf32, #tpu.memory_space<vmem>>, %arg8: memref<8x256xf32, #tpu.memory_space<vmem>>) attributes {dimension_semantics = [#tpu.dimension_semantics<parallel>, #tpu.dimension_semantics<arbitrary>, #tpu.dimension_semantics<arbitrary>], iteration_bounds = array<i64: 2, 3, 2>, scalar_prefetch = 1 : i64, scratch_operands = 1 : i64, tpu.core_type = #tpu.core_type<tc>, window_params = [{transform_indices = @transform_0, window_bounds = array<i64: 8, 128>}, {transform_indices = @transform_1, window_bounds = array<i64: 1, 128, 256>}, {transform_indices = @transform_2, window_bounds = array<i64: 1, 256>}, {transform_indices = @transform_3, window_bounds = array<i64: 8, 256>}]} {
    %c0_i32 = arith.constant 0 : i32
    %0 = arith.cmpi eq, %arg1, %c0_i32 : i32
    %c0_i32_0 = arith.constant 0 : i32
    %1 = arith.cmpi eq, %arg2, %c0_i32_0 : i32
    %2 = arith.andi %0, %1 : i1
    %3 = arith.extui %2 : i1 to i32
    %c0_i32_1 = arith.constant 0 : i32
    %4 = arith.cmpi ne, %3, %c0_i32_1 : i32
    scf.if %4 {
      %cst_11 = arith.constant 0.000000e+00 : f32
      %21 = vector.broadcast %cst_11 : f32 to vector<8x256xf32>
      %c0_12 = arith.constant 0 : index
      %c0_13 = arith.constant 0 : index
      %22 = vector.load %arg8[%c0_12, %c0_13] : memref<8x256xf32, #tpu.memory_space<vmem>>, vector<8x256xf32>
      tpu.vector_store %arg8[%c0_12, %c0_13], %21 {strides = array<i32>} : memref<8x256xf32, #tpu.memory_space<vmem>>, vector<8x256xf32>,
    } else {
    }
    %c0 = arith.constant 0 : index
    %c0_2 = arith.constant 0 : index
    %5 = vector.load %arg4[%c0, %c0_2] : memref<8x128xf32, #tpu.memory_space<vmem>>, vector<8x128xf32>
    %c0_3 = arith.constant 0 : index
    %c0_4 = arith.constant 0 : index
    %c0_5 = arith.constant 0 : index
    %6 = vector.load %arg5[%c0_3, %c0_4, %c0_5] : memref<1x128x256xf32, #tpu.memory_space<vmem>>, vector<1x128x256xf32>
    %7 = vector.shape_cast %6 : vector<1x128x256xf32> to vector<128x256xf32>
    %cst = arith.constant dense<0.000000e+00> : vector<8x256xf32>
    %8 = tpu.matmul %5, %7, %cst {dimension_numbers = #tpu.dot_dimension_numbers<[1], [0], [0], [1], [0, 0, 1, 1], [], []>} : vector<8x128xf32>, vector<128x256xf32>, vector<8x256xf32> -> vector<8x256xf32>
    %c0_6 = arith.constant 0 : index
    %c0_7 = arith.constant 0 : index
    %9 = vector.load %arg8[%c0_6, %c0_7] : memref<8x256xf32, #tpu.memory_space<vmem>>, vector<8x256xf32>
    %10 = arith.index_cast %arg1 : i32 to index
    %11 = memref.load %arg3[%10] : memref<3xf32, #tpu.memory_space<smem>>
    %12 = vector.broadcast %11 : f32 to vector<8x256xf32>
    %13 = arith.mulf %12, %8 : vector<8x256xf32>
    %14 = arith.addf %9, %13 : vector<8x256xf32>
    %c0_8 = arith.constant 0 : index
    %c0_9 = arith.constant 0 : index
    %15 = vector.load %arg8[%c0_8, %c0_9] : memref<8x256xf32, #tpu.memory_space<vmem>>, vector<8x256xf32>
    tpu.vector_store %arg8[%c0_8, %c0_9], %14 {strides = array<i32>} : memref<8x256xf32, #tpu.memory_space<vmem>>, vector<8x256xf32>,
    %c2_i32 = arith.constant 2 : i32
    %16 = arith.cmpi eq, %arg1, %c2_i32 : i32
    %c1_i32 = arith.constant 1 : i32
    %17 = arith.cmpi eq, %arg2, %c1_i32 : i32
    %18 = arith.andi %16, %17 : i1
    %19 = arith.extui %18 : i1 to i32
    %c0_i32_10 = arith.constant 0 : i32
    %20 = arith.cmpi ne, %19, %c0_i32_10 : i32
    scf.if %20 {
      %c0_11 = arith.constant 0 : index
      %c0_12 = arith.constant 0 : index
      %21 = vector.load %arg8[%c0_11, %c0_12] : memref<8x256xf32, #tpu.memory_space<vmem>>, vector<8x256xf32>
      %c0_13 = arith.constant 0 : index
      %c0_14 = arith.constant 0 : index
      %22 = vector.load %arg6[%c0_13, %c0_14] : memref<1x256xf32, #tpu.memory_space<vmem>>, vector<1x256xf32>
      %23 = vector.broadcast %22 : vector<1x256xf32> to vector<8x256xf32>
      %24 = arith.addf %21, %23 : vector<8x256xf32>
      %c0_15 = arith.constant 0 : index
      %c0_16 = arith.constant 0 : index
      %25 = vector.load %arg7[%c0_15, %c0_16] : memref<8x256xf32, #tpu.memory_space<vmem>>, vector<8x256xf32>
      tpu.vector_store %arg7[%c0_15, %c0_16], %24 {strides = array<i32>} : memref<8x256xf32, #tpu.memory_space<vmem>>, vector<8x256xf32>,
    } else {
    }
    return
  }
  func.func @transform_0(%arg0: i32, %arg1: i32, %arg2: i32, %arg3: memref<3xf32, #tpu.memory_space<smem>>) -> (i32, i32) {
    %c0_i32 = arith.constant 0 : i32
    %c0_i32_0 = arith.constant 0 : i32
    return %c0_i32, %arg2 : i32, i32
  }
  func.func @transform_1(%arg0: i32, %arg1: i32, %arg2: i32, %arg3: memref<3xf32, #tpu.memory_space<smem>>) -> (i32, i32, i32) {
    %c0_i32 = arith.constant 0 : i32
    return %arg1, %arg2, %arg0 : i32, i32, i32
  }
  func.func @transform_2(%arg0: i32, %arg1: i32, %arg2: i32, %arg3: memref<3xf32, #tpu.memory_space<smem>>) -> (i32, i32) {
    %c0_i32 = arith.constant 0 : i32
    %c0_i32_0 = arith.constant 0 : i32
    return %c0_i32, %arg0 : i32, i32
  }
  func.func @transform_3(%arg0: i32, %arg1: i32, %arg2: i32, %arg3: memref<3xf32, #tpu.memory_space<smem>>) -> (i32, i32) {
    %c0_i32 = arith.constant 0 : i32
    %c0_i32_0 = arith.constant 0 : i32
    return %c0_i32, %arg0 : i32, i32
  }
}

</mosaic_0001>

<bundles_post_ra>
// kernel: tpu_custom_call.1
= control target key start
LH: loop header
LB: loop body
LE: loop exit
PB: predicated region body
PF: predicated region fallthrough
CT: control target
= control target key end

     0   :  { %s1608_s0 = inlined_call_operand.hbm [shape: f32[3], index: 0, kind: input, shape index: {}]   ;;  %s1609_s1 = inlined_call_operand.hbm [shape: f32[8,256], index: 1, kind: input, shape index: {}]   ;;  %s1610_s2 = inlined_call_operand.hbm [shape: f32[3,256,512], index: 2, kind: input, shape index: {}]   ;;  %s1611_s3 = inlined_call_operand.hbm [shape: f32[1,512], index: 3, kind: input, shape index: {}]   ;;  %s1612_s4 = inlined_call_operand.hbm [shape: f32[8,512], index: 4, kind: output, shape index: {}]  }
   0x1   :  { %1630 = sst [smem:[#allocation26_spill]] %s1609_s1  ;;  %s812_s17 = scalar_lea.hbm %s1608_s0, 16 }
   0x2   :  { %1631 = sst [smem:[#allocation27_spill]] %s1610_s2  ;;  %p813_p0 = scmp.ne.s32.totalorder %s1608_s0, %s812_s17 }
   0x3   :  { %1632 = sst [smem:[#allocation28_spill]] %s1612_s4  ;;  %p816_p1 = scmp.lt.u32.totalorder %s812_s17, %s1608_s0 }
   0x5   :  { %p818_p2 = pnand %p816_p1, %p813_p0 }
   0x7   :  { %821 = shalt.err (!%p818_p2)  }
   0x8   :  { %s1086_s22 = smov [#allocation4]  }
   0x9   :  { %10 = dma.hbm_to_smem %s1608_s0, 16, %s1086_s22, [#allocation3] }
   0xa   :  { %1004 = dma.done.wait [#allocation3], 16 }
   0xb   :  { %1005 = vsyncadd [#allocation3], 4294967280 }
   0xc   :  { %12 = sfence }
   0xd   :  { %13 = vsyncpa [#allocation6], 0 }
   0xe   :  { %15 = vsyncpa [#allocation6 + $0x1], 0 }
   0xf   :  { %16 = vsyncpa [#allocation9], 0 }
  0x10   :  { %18 = vsyncpa [#allocation9 + $0x1], 0 }
  0x11   :  { %19 = vsyncpa [#allocation7], 0 }
  0x12   :  { %21 = vsyncpa [#allocation7 + $0x1], 0  ;;  %s1133_s25 = smov 0   ;;  %s1135_s26 = smov 0  }
  0x13   :  { %s1137_s27 = smov 0   ;;  %s1139_s28 = smov 0  }
  0x14   :  { %s1141_s29 = smov 0   ;;  %s1143_s0 = smov 0  }
  0x15   :  { %s1145_s30 = smov 0   ;;  %s1147_s5 = smov 0  }
  0x16   :  { %s1149_s6 = smov 0   ;;  %s1151_s7 = smov 0  }
  0x17   :  { %s1153_s8 = smov 0   ;;  %s1155_s9 = smov 0  }
  0x18   :  { %s1157_s10 = smov 0   ;;  %s1159_s11 = smov 0  }
  0x19   :  { %s1161_s12 = smov 0   ;;  %s1163_s13 = smov 0  }
  0x1a LB: > { %1633 = sst [smem:[#allocation17_spill]] %s1040_s29  ;;  %p1624_p3 = scmp.eq.s32.totalorder %s1084_s13, 0  ;;  %s1084_s13 = sphi %s1163_s13, %s27_s13   ;;  %s1080_s12 = sphi %s1161_s12, %s1697_s12   ;;  %s1076_s11 = sphi %s1159_s11, %s1696_s11   ;;  %s1072_s10 = sphi %s1157_s10, %s1695_s10   ;;  %s1068_s9 = sphi %s1155_s9, %s1694_s9   ;;  %s1064_s8 = sphi %s1153_s8, %s1693_s8   ;;  %s1060_s7 = sphi %s1151_s7, %s1692_s7   ;;  %s1056_s6 = sphi %s1149_s6, %s1691_s6   ;;  %s1052_s5 = sphi %s1147_s5, %s1690_s5   ;;  %s1048_s30 = sphi %s1145_s30, %s1689_s30   ;;  %s1044_s0 = sphi %s1143_s0, %s1688_s0   ;;  %s1040_s29 = sphi %s1141_s29, %s1687_s29   ;;  %s1036_s28 = sphi %s1139_s28, %s1680_s28   ;;  %s1032_s27 = sphi %s1137_s27, %s1686_s27   ;;  %s1028_s26 = sphi %s1135_s26, %s1685_s26   ;;  %s1024_s25 = sphi %s1133_s25, %s1684_s25  }
  0x1b   : > { %1634 = sst [smem:[#allocation18_spill]] %s1060_s7  ;;  %p90_p4 = scmp.ne.s32.totalorder %s1044_s0, %s1040_s29 }
  0x1c   : > { %1635 = sst [smem:[#allocation19_spill]] %s1064_s8  ;;  %p1615_p6 = scmp.lt.s32.totalorder %s1084_s13, 12 }
  0x1d   : > { %1636 = sst [smem:[#allocation20_spill]] %s1068_s9  ;;  %p1224_p7 = por %p90_p4, %p1624_p3 }
  0x1e   : > { %s190_s18 = sand.u32 1, %s1084_s13   ;;  %s192_s19 = sand.u32 1, %s1044_s0  }
  0x1f   : > { %s600_s20 = sshll.u32 %s192_s19, 8  ;;  %s602_s21 = sshll.u32 %s1080_s12, 1 }
  0x20   : > { %s619_s22 = sshll.u32 %s1072_s10, 6  ;;  %s604_s24 = sshll.u32 %s1076_s11, 7 }
  0x21   : > { %s201_s23 = sadd.s32 %s619_s22, %s602_s21  ;;  %s194_s14 = scalar_lea.vmem [#allocation8], %s600_s20 }
  0x22   : > { %s203_s15 = sadd.s32 %s604_s24, %s201_s23  ;;  %s206_s16 = sshll.u32 %s194_s14, 4  ;;  %s1233_s16 = int_to_ptr.vmem [resolvable:$true] %s206_s16 }
  0x23   : > { %s605_s4 = sshll.u32 %s203_s15, 7  ;;  %s1638_s2 = sld [smem:[#allocation27_spill]] }
  0x24   : > { %p1244_p8 = pnand %p1615_p6, %p1224_p7  ;;  %s1248_s14 = scalar_lea.sflag [#allocation9], %s190_s18 }
  0x26   : > { %p824_p10 = pneg %p1244_p8 }
  0x29   : > { %s1238_s8 = scalar_lea.hbm %s1638_s2, %s605_s4  ;;  %s827_s9 = scalar_lea.hbm %s1638_s2, 49152 }
  0x2a   : > { %s822_s15 = scalar_lea.hbm %s1238_s8, 4096  ;;  %p828_p13 = scmp.lt.u32.totalorder %s1238_s8, %s1638_s2 }
  0x2b   : > { %p823_p9 = scmp.ne.s32.totalorder %s1238_s8, %s822_s15  ;;  %p829_p0 = scmp.lt.u32.totalorder %s827_s9, %s822_s15 }
  0x2c   : > { %p831_p2 = scmp.lt.u32.totalorder %s822_s15, %s1238_s8 }
  0x2d   : > { %p825_p11 = pnand %p824_p10, %p823_p9  ;;  %p830_p1 = por %p829_p0, %p828_p13 }
  0x2f   : > { %p826_p12 = pneg %p825_p11  ;;  %p832_p4 = por %p831_p2, %p830_p1 }
  0x31   : > { %p833_p7 = pnand %p832_p4, %p826_p12 }
  0x33   : > { %836 = shalt.err (!%p833_p7)
}
  0x34   : > { %s837_s18 = scalar_lea.vmem %s1233_s16, 4096  ;;  %s1087_s21 = smov [#allocation8]  }
  0x35   : > { %p838_p9 = scmp.ne.s32.totalorder %s1233_s16, %s837_s18  ;;  %s842_s22 = sshll.u32 %s1087_s21, 4  ;;  %s843_s22 = int_to_ptr.vmem [resolvable:$false] %s842_s22 }
  0x36   : > { %s844_s23 = scalar_lea.vmem %s843_s22, 8192  ;;  %p845_p5 = scmp.lt.s32.totalorder %s1233_s16, %s843_s22 }
  0x37   : > { %p840_p11 = pnand %p838_p9, %p824_p10  ;;  %p846_p13 = scmp.lt.s32.totalorder %s844_s23, %s837_s18 }
  0x39   : > { %p841_p6 = pneg %p840_p11  ;;  %p847_p0 = por %p846_p13, %p845_p5 }
  0x3b   : > { %p848_p1 = pnand %p847_p0, %p841_p6 }
  0x3d   : > { %851 = shalt.err (!%p848_p1)
}
  0x3e   : > { %s1088_s24 = smov 512   ;;  %s1089_s15 = smov 256  }
  0x3f   : > { %s1090_s4 = smov 16   ;;  %p609_p5 = scmp.ge.s32.totalorder %s1084_s13, 1 }
  0x40   : > { %668 = dma.hbm_to_vmem [thread:$0]  (!%p1244_p8), %s1238_s8, 4096, %s1233_s16, %s1248_s14, %s1088_s24, %s1089_s15, %s1090_s4  }
  0x41   : > { %p233_p6 = scmp.lt.s32.totalorder %s1084_s13, 13  ;;  %s1283_s9 = sadd.s32 4294967295, %s1084_s13  }
  0x42   : > { %s39_s17 = sadd.s32 1, %s1072_s10  ;;  %s53_s20 = sadd.s32 1, %s1056_s6 }
  0x43   : > { %p1278_p10 = pnand %p609_p5, %p233_p6  ;;  %p40_p12 = scmp.ge.s32.totalorder %s39_s17, 2 }
  0x44   : > { %p60_p8 = scmp.ne.s32.totalorder %s1056_s6, %s1052_s5  ;;  %p66_p2 = scmp.ne.s32.totalorder %s1052_s5, %s1048_s30 }
  0x45   : > { %s1640_s7 = scalar_select %p1278_p10, 1, 0 }
  0x46   : > { %p1623_p4 = scmp.eq.s32.totalorder %s1283_s9, 0  ;;  %s1699_s17 = smov (%p40_p12, %s39_s17), 0 }
  0x47   : > { %1641 = sst [smem:[#allocation21_spill]] %s1699_s17  ;;  %s1642_s8 = sadd.s32 1, %s1076_s11 }
  0x48   : > { %s1701_s8 = smov (!%p40_p12, %s1642_s8), %s1076_s11  ;;  %s50_s16 = ssub.s32 %s1072_s10, %s1699_s17 }
  0x49   : > { %p1301_p7 = por %p1624_p3, %p60_p8  ;;  %p44_p9 = scmp.ge.s32.totalorder %s1701_s8, 3 }
  0x4a   : > { %p51_p11 = scmp.eq.s32.totalorder %s50_s16, 0  ;;  %p1307_p13 = por %p1623_p4, %p66_p2 }
  0x4b   : > { %p1646_p0 = scmp.ne.s32.totalorder %s1040_s29, %s1036_s28  ;;  %s1703_s8 = smov (%p44_p9, %s1701_s8), 0 }
  0x4c   : > { %s1644_s30 = scalar_select %p1307_p13, 1, 0 }
  0x4d   : > { %p1316_p1 = por %p1646_p0, %p1623_p4  ;;  %1649 = sst [smem:[#allocation24_spill]] %s1703_s8 }
  0x4e   : > { %1645 = sst [smem:[#allocation22_spill]] %s1644_s30  ;;  %s1650_s21 = sadd.s32 1, %s1080_s12 }
  0x4f   : > { %s1647_s18 = scalar_select %p1316_p1, 1, 0 }
  0x50   : > { %s1705_s21 = smov (!%p44_p9, %s1650_s21), %s1080_s12  ;;  %s76_s23 = ssub.s32 %s1076_s11, %s1703_s8 }
  0x51   : > { %1648 = sst [smem:[#allocation23_spill]] %s1647_s18  ;;  %p48_p5 = scmp.ge.s32.totalorder %s1705_s21, 2 }
  0x52   : > { %s1326_s22 = scalar_select %p51_p11, %s1056_s6, %s53_s20  }
  0x53   : > { %s78_s24 = sor.u32 %s76_s23, %s50_s16  ;;  %s172_s15 = sand.u32 1, %s1056_s6  }
  0x54   : > { %s1707_s21 = smov (%p48_p5, %s1705_s21), 0  ;;  %s598_s28 = sshll.u32 %s172_s15, 3 }
  0x55   : > { %1651 = sst [smem:[#allocation25_spill]] %s1707_s21  ;;  %s1335_s4 = ssub.s32 %s1080_s12, %s1707_s21 }
  0x56   : > { %s80_s2 = sor.u32 %s1335_s4, %s78_s24  ;;  %s599_s17 = sshll.u32 %s1072_s10, 7 }
  0x57   : > { %p81_p6 = scmp.eq.s32.totalorder %s80_s2, 0  ;;  %s1652_s1 = sld [smem:[#allocation26_spill]] }
  0x58   : > { %s176_s20 = scalar_lea.vmem [#allocation5], %s598_s28  ;;  %p1653_p12 = scmp.lt.s32.totalorder %s1084_s13, 12 }
  0x59   : > { %s183_s16 = sshll.u32 %s176_s20, 4  ;;  %s1655_s24 = sadd.s32 1, %s1044_s0  ;;  %s1357_s16 = int_to_ptr.vmem [resolvable:$true] %s183_s16 }
  0x5a   : > { %p1348_p8 = pnand %p1653_p12, %p1301_p7  ;;  %s173_s29 = scalar_lea.sflag [#allocation6], %s172_s15 }
  0x5b   : > { %s1355_s2 = scalar_select %p81_p6, %s1044_s0, %s1655_s24  }
  0x5c   : > { %p854_p9 = pneg %p1348_p8 }
  0x5d   : > { %s1342_s30 = scalar_lea.hbm %s1652_s1, %s599_s17  ;;  %s857_s28 = scalar_lea.hbm %s1652_s1, 256 }
  0x5e   : > { %s852_s17 = scalar_lea.hbm %s1342_s30, 128  ;;  %p858_p7 = scmp.lt.u32.totalorder %s1342_s30, %s1652_s1 }
  0x5f   : > { %p853_p2 = scmp.ne.s32.totalorder %s1342_s30, %s852_s17  ;;  %p859_p5 = scmp.lt.u32.totalorder %s857_s28, %s852_s17 }
  0x60   : > { %p861_p12 = scmp.lt.u32.totalorder %s852_s17, %s1342_s30 }
  0x61   : > { %p855_p11 = pnand %p854_p9, %p853_p2  ;;  %p860_p6 = por %p859_p5, %p858_p7 }
  0x63   : > { %p856_p0 = pneg %p855_p11  ;;  %p862_p4 = por %p861_p12, %p860_p6 }
  0x65   : > { %p863_p3 = pnand %p862_p4, %p856_p0 }
  0x67   : > { %866 = shalt.err (!%p863_p3)
}
  0x68   : > { %s867_s15 = scalar_lea.vmem %s1357_s16, 128  ;;  %s1091_s24 = smov [#allocation5]  }
  0x69   : > { %p868_p2 = scmp.ne.s32.totalorder %s1357_s16, %s867_s15  ;;  %s872_s19 = sshll.u32 %s1091_s24, 4  ;;  %s873_s19 = int_to_ptr.vmem [resolvable:$false] %s872_s19 }
  0x6a   : > { %s874_s21 = scalar_lea.vmem %s873_s19, 256  ;;  %p875_p13 = scmp.lt.s32.totalorder %s1357_s16, %s873_s19 }
  0x6b   : > { %p870_p11 = pnand %p868_p2, %p854_p9  ;;  %p876_p7 = scmp.lt.s32.totalorder %s874_s21, %s867_s15 }
  0x6d   : > { %p871_p1 = pneg %p870_p11  ;;  %p877_p5 = por %p876_p7, %p875_p13 }
  0x6f   : > { %p878_p6 = pnand %p877_p5, %p871_p1 }
  0x71   : > { %881 = shalt.err (!%p878_p6)
}
  0x72   : > { %665 = dma.hbm_to_vmem [thread:$0]  (!%p1348_p8), %s1342_s30, 128, %s1357_s16, %s173_s29  }
  0x73   : > { %s595_s17 = sadd.s32 4294967294, %s1084_s13   ;;  %p107_p3 = scmp.eq.s32.totalorder %s1335_s4, 0 }
  0x74   : > { %s109_s18 = sadd.s32 1, %s1032_s27  ;;  %p116_p4 = scmp.ne.s32.totalorder %s1032_s27, %s1028_s26 }
  0x75   : > { %s1390_s23 = scalar_select %p107_p3, %s1032_s27, %s109_s18  }
  0x76   : > { %p1656_p13 = scmp.eq.s32.totalorder %s1084_s13, 0  ;;  %p122_p9 = scmp.ne.s32.totalorder %s1028_s26, %s1024_s25 }
  0x77   : > { %p146_p0 = scmp.eq.s32.totalorder %s1283_s9, 11  ;;  %p152_p12 = scmp.eq.s32.totalorder %s595_s17, 11 }
  0x78   : > { %p1394_p1 = por %p116_p4, %p1656_p13  ;;  %p1658_p2 = scmp.eq.s32.totalorder %s1283_s9, 0 }
  0x79   : > { %s218_s30 = sand.u32 1, %s1032_s27   ;;  %p1408_p8 = por %p146_p0, %p116_p4 }
  0x7a   : > { %p1403_p11 = por %p122_p9, %p1658_p2  ;;  %p1412_p7 = por %p152_p12, %p122_p9 }
  0x7b   : > { %s1660_s4 = scalar_select %p1408_p8, 1, 0 }
  0x7c   : > { %s1659_s20 = scalar_select %p1403_p11, 1, 0 }
  0x7d   : > { %s1661_s16 = scalar_select %p1412_p7, 1, 0 }
  0x7e   : > { %s606_s29 = sshll.u32 %s218_s30, 1  ;;  %s620_s15 = sshll.u32 %s1080_s12, 5 }
  0x7f   : > { %s1420_s21 = scalar_lea.hbm %s1611_s3, %s620_s15  ;;  %s220_s17 = scalar_lea.vmem [#allocation10], %s606_s29 }
  0x80   : > { %s228_s18 = sshll.u32 %s220_s17, 4  ;;  %p1662_p5 = scmp.lt.s32.totalorder %s1084_s13, 12  ;;  %s229_s18 = int_to_ptr.vmem [resolvable:$true] %s228_s18 }
  0x81   : > { %s882_s30 = scalar_lea.hbm %s1420_s21, 32  ;;  %s887_s28 = scalar_lea.hbm %s1611_s3, 64 }
  0x82   : > { %p1426_p6 = pnand %p1662_p5, %p1394_p1  ;;  %p883_p3 = scmp.ne.s32.totalorder %s1420_s21, %s882_s30 }
  0x83   : > { %p888_p1 = scmp.lt.u32.totalorder %s1420_s21, %s1611_s3  ;;  %p889_p0 = scmp.lt.u32.totalorder %s887_s28, %s882_s30 }
  0x84   : > { %p884_p4 = pneg %p1426_p6  ;;  %p891_p2 = scmp.lt.u32.totalorder %s882_s30, %s1420_s21 }
  0x85   : > { %p890_p12 = por %p889_p0, %p888_p1 }
  0x86   : > { %p885_p13 = pnand %p884_p4, %p883_p3 }
  0x87   : > { %p892_p5 = por %p891_p2, %p890_p12 }
  0x88   : > { %p886_p9 = pneg %p885_p13 }
  0x8a   : > { %p893_p7 = pnand %p892_p5, %p886_p9 }
  0x8c   : > { %896 = shalt.err (!%p893_p7)
}
  0x8d   : > { %s897_s17 = scalar_lea.vmem %s229_s18, 32  ;;  %s1092_s8 = smov [#allocation10]  }
  0x8e   : > { %p898_p8 = scmp.ne.s32.totalorder %s229_s18, %s897_s17  ;;  %s902_s15 = sshll.u32 %s1092_s8, 4  ;;  %s903_s15 = int_to_ptr.vmem [resolvable:$false] %s902_s15 }
  0x8f   : > { %s904_s29 = scalar_lea.vmem %s903_s15, 64  ;;  %p905_p11 = scmp.lt.s32.totalorder %s229_s18, %s903_s15 }
  0x90   : > { %p900_p3 = pnand %p898_p8, %p884_p4  ;;  %p906_p10 = scmp.lt.s32.totalorder %s904_s29, %s897_s17 }
  0x92   : > { %p901_p13 = pneg %p900_p3  ;;  %p907_p0 = por %p906_p10, %p905_p11 }
  0x94   : > { %p908_p1 = pnand %p907_p0, %p901_p13 }
  0x96   : > { %911 = shalt.err (!%p908_p1)
}
  0x97   : > { %671 = dma.hbm_to_vmem [thread:$0]  (!%p1426_p6), %s1420_s21, 32, %s229_s18, %s1248_s14  }
  0x98   : > { %p1664_p7 = scmp.ne.s32.totalorder %s1640_s7, 0 }
  0x99   : > { %s1665_s30 = sld [smem:[#allocation22_spill]] (!%p1664_p7)  ;;  %s239_s28 = sand.u32 (!%p1664_p7), 1, %s1052_s5  }
  0x9a   : > { %237 = sbr.rel (%p1664_p7) target bundleno = 483 (0x1e3), region = 32  ;;  %s1455_s24 = sshll.u32 (!%p1664_p7), %s239_s28, 3 }
  0x9b   : > { %s240_s8 = scalar_lea.sflag (!%p1664_p7), [#allocation6], %s239_s28  ;;  %s243_s19 = scalar_lea.vmem (!%p1664_p7), [#allocation5], %s1455_s24 }
  0x9f   : > { %p1666_p8 = scmp.ne.s32.totalorder (!%p1664_p7), %s1665_s30, 0 }
  0xa1   : > { %1007 = dma.done.wait (%p1666_p8), %s240_s8, 128  }
  0xa2   : > { %1009 = vsyncadd (%p1666_p8), %s240_s8, 4294967168  ;;  %s1667_s1 = sld [smem:[#allocation17_spill]]  ;;  %s248_s14 = sand.u32 1, %s1283_s9  }
  0xa3   : > { %s1668_s17 = sld [smem:[#allocation23_spill]]  ;;  %s249_s18 = scalar_lea.sflag [#allocation9], %s248_s14 }
  0xa8   : > { %s250_s21 = sand.u32 1, %s1667_s1  }
  0xa9   : > { %s611_s7 = sshll.u32 %s250_s21, 8  ;;  %p1669_p10 = scmp.ne.s32.totalorder %s1668_s17, 0 }
  0xaa   : > { %s1464_s15 = scalar_lea.vmem [#allocation8], %s611_s7 }
  0xab   : > { %1011 = dma.done.wait (%p1669_p10), %s249_s18, 4096  }
  0xac   : > { %1013 = vsyncadd (%p1669_p10), %s249_s18, 4294963200  ;;  %s1471_s29 = sand.u32 1, %s1028_s26   ;;  %p1670_p11 = scmp.ne.s32.totalorder %s1659_s20, 0 }
  0xad   : > { %s612_s30 = sshll.u32 %s1471_s29, 1 }
  0xae   : > { %s1474_s28 = scalar_lea.vmem [#allocation10], %s612_s30 }
  0xaf   : > { %1015 = dma.done.wait (%p1670_p11), %s249_s18, 32  }
  0xb0   : > { %1017 = vsyncadd (%p1670_p11), %s249_s18, 4294967264  ;;  %s1671_s9 = sld [smem:[#allocation19_spill]]  ;;  %s1672_s8 = sld [smem:[#allocation18_spill]] }
  0xb1   : > { %s613_s1 = sshll.u32 %s1471_s29, 4 }
  0xb2   : > { %s1483_s17 = scalar_lea.vmem [#allocation11], %s613_s1 }
  0xb6   : > { %p298_p6 = scmp.eq.s32.totalorder %s1671_s9, 0  ;;  %p299_p4 = scmp.eq.s32.totalorder %s1672_s8, 0 }
  0xb8   : > { %p300_p9 = pnand %p299_p4, %p298_p6 }
  0xb9   : > { %v1093_v0 = vmov (!%p300_p9), 0.0  }
  0xba   : > { %303 = sbr.rel (%p300_p9) target bundleno = 193 (0xc1), region = 48  ;;  %304 = vst [vmem:[#allocation2] sm:$0xff] (!%p300_p9), %v1093_v0  ;;  %305 = vst [vmem:[#allocation2 + $0x8] sm:$0xff] (!%p300_p9), %v1093_v0 }
  0xc1 PF: > { %v308_v1 = vld [vmem:[%s1464_s15 + $0x8] sm:$0xff]  ;;  %v310_v2 = vld [vmem:[%s1464_s15 + $0x18] sm:$0xff]  ;;  %v307_v3 = vld [vmem:[%s1464_s15] sm:$0xff]  ;;  %v1094_v8 = vmov 0.0   ;;  %s1673_s20 = sld [smem:[#allocation19_spill]]  ;;  %s1674_s14 = sld [smem:[#allocation18_spill]] }
  0xc2   : > { %v622_v4 = vpack.c.bf16 %v310_v2, %v308_v1  ;;  %v309_v5 = vld [vmem:[%s1464_s15 + $0x10] sm:$0xff]  ;;  %v312_v6 = vld [vmem:[%s1464_s15 + $0x28] sm:$0xff]  ;;  %v314_v7 = vld [vmem:[%s1464_s15 + $0x38] sm:$0xff]  ;;  %403 = vmatprep.mubr.f32.mxu0 %v1094_v8 }
  0xc3   : > { %v624_v9 = vpack.c.bf16 %v309_v5, %v307_v3  ;;  %v626_v10 = vpack.c.bf16 %v314_v7, %v312_v6  ;;  %v311_v11 = vld [vmem:[%s1464_s15 + $0x20] sm:$0xff]  ;;  %v313_v12 = vld [vmem:[%s1464_s15 + $0x30] sm:$0xff]  ;;  %v316_v13 = vld [vmem:[%s1464_s15 + $0x48] sm:$0xff] }
  0xc4   : > { %623 = vmatprep.subr.bf16.mxu0 %v622_v4  ;;  %v318_v14 = vld [vmem:[%s1464_s15 + $0x58] sm:$0xff]  ;;  %v628_v15 = vpack.c.bf16 %v313_v12, %v311_v11  ;;  %v315_v17 = vld [vmem:[%s1464_s15 + $0x40] sm:$0xff]  ;;  %v317_v18 = vld [vmem:[%s1464_s15 + $0x50] sm:$0xff] }
  0xc5   : > { %625 = vmatpush1.bf16.msra.mxu0 %v624_v9  ;;  %v630_v16 = vpack.c.bf16 %v318_v14, %v316_v13  ;;  %v320_v19 = vld [vmem:[%s1464_s15 + $0x68] sm:$0xff]  ;;  %v322_v20 = vld [vmem:[%s1464_s15 + $0x78] sm:$0xff]  ;;  %v632_v21 = vpack.c.bf16 %v317_v18, %v315_v17  ;;  %v319_v23 = vld [vmem:[%s1464_s15 + $0x60] sm:$0xff] }
  0xc6   : > { %627 = vmatprep.subr.bf16.mxu0 %v626_v10  ;;  %v634_v22 = vpack.c.bf16 %v322_v20, %v320_v19  ;;  %v321_v24 = vld [vmem:[%s1464_s15 + $0x70] sm:$0xff]  ;;  %v324_v25 = vld [vmem:[%s1464_s15 + $0x88] sm:$0xff]  ;;  %v326_v26 = vld [vmem:[%s1464_s15 + $0x98] sm:$0xff] }
  0xc7   : > { %v636_v27 = vpack.c.bf16 %v321_v24, %v319_v23  ;;  %v638_v28 = vpack.c.bf16 %v326_v26, %v324_v25  ;;  %v323_v29 = vld [vmem:[%s1464_s15 + $0x80] sm:$0xff]  ;;  %v325_v30 = vld [vmem:[%s1464_s15 + $0x90] sm:$0xff]  ;;  %v328_v31 = vld [vmem:[%s1464_s15 + $0xa8] sm:$0xff]  ;;  %p420_p12 = scmp.eq.s32.totalorder %s1673_s20, 2  ;;  %p421_p2 = scmp.eq.s32.totalorder %s1674_s14, 1 }
  0xc8   : > { %v330_v32 = vld [vmem:[%s1464_s15 + $0xb8] sm:$0xff]  ;;  %v640_v33 = vpack.c.bf16 %v325_v30, %v323_v29  ;;  %v327_v35 = vld [vmem:[%s1464_s15 + $0xa0] sm:$0xff]  ;;  %v329_v36 = vld [vmem:[%s1464_s15 + $0xb0] sm:$0xff]  ;;  %s412_s21 = sld [smem:[#allocation4 + %s1673_s20]] }
  0xc9   : > { %629 = vmatpush1.bf16.msra.mxu0 %v628_v15  ;;  %v642_v34 = vpack.c.bf16 %v330_v32, %v328_v31  ;;  %v332_v37 = vld [vmem:[%s1464_s15 + $0xc8] sm:$0xff]  ;;  %v334_v38 = vld [vmem:[%s1464_s15 + $0xd8] sm:$0xff]  ;;  %v644_v39 = vpack.c.bf16 %v329_v36, %v327_v35  ;;  %v331_v41 = vld [vmem:[%s1464_s15 + $0xc0] sm:$0xff]  ;;  %p422_p5 = pnand %p421_p2, %p420_p12 }
  0xca   : > { %631 = vmatprep.subr.bf16.mxu0 %v630_v16  ;;  %v646_v40 = vpack.c.bf16 %v334_v38, %v332_v37  ;;  %v333_v42 = vld [vmem:[%s1464_s15 + $0xd0] sm:$0xff]  ;;  %v336_v43 = vld [vmem:[%s1464_s15 + $0xe8] sm:$0xff]  ;;  %v338_v44 = vld [vmem:[%s1464_s15 + $0xf8] sm:$0xff]  ;;  %v430_v60 = vlaneseq (!%p422_p5) }
  0xcb   : > { %v648_v45 = vpack.c.bf16 %v333_v42, %v331_v41  ;;  %v650_v46 = vpack.c.bf16 %v338_v44, %v336_v43  ;;  %v335_v47 = vld [vmem:[%s1464_s15 + $0xe0] sm:$0xff]  ;;  %v337_v48 = vld [vmem:[%s1464_s15 + $0xf0] sm:$0xff]  ;;  %v411_v56 = vld [vmem:[#allocation2 + $0x8] sm:$0xff] }
  0xcc   : > { %v652_v49 = vpack.c.bf16 %v337_v48, %v335_v47  ;;  %v306_v50 = vld [vmem:[%s243_s19] sm:$0xff]  ;;  %v410_v53 = vld [vmem:[#allocation2] sm:$0xff]  ;;  %v431_v61 = vshrl.u32 (!%p422_p5), %v430_v60, 7 }
  0xcd   : > { %633 = vmatpush1.bf16.msra.mxu0 %v632_v21  ;;  %v428_v62 = vld [vmem:[%s1474_s28] sm:$0x3] (!%p422_p5) }
  0xce   : > { %635 = vmatprep.subr.bf16.mxu0 %v634_v22  ;;  %v413_v51 = vstv %s412_s21  ;;  %v432_v63 = vsub.s32 (!%p422_p5), 0, %v431_v61  ;;  %v436_v0 = vsub.s32 (!%p422_p5), 1, %v431_v61 }
  0xd0   : > { %v433_v3 = vrot.slane (!%p422_p5), %v428_v62, %v432_v63  ;;  %v437_v4 = vrot.slane (!%p422_p5), %v428_v62, %v436_v0 }
  0xd1   : > { %637 = vmatpush1.bf16.msra.mxu0 %v636_v27 }
  0xd2   : > { %639 = vmatprep.subr.bf16.mxu0 %v638_v28 }
  0xd5   : > { %641 = vmatpush1.bf16.msra.mxu0 %v640_v33 }
  0xd6   : > { %643 = vmatprep.subr.bf16.mxu0 %v642_v34 }
  0xd9   : > { %645 = vmatpush1.bf16.msra.mxu0 %v644_v39 }
  0xda   : > { %647 = vmatprep.subr.bf16.mxu0 %v646_v40 }
  0xdd   : > { %649 = vmatpush1.bf16.msra.mxu0 %v648_v45 }
  0xde   : > { %651 = vmatprep.subr.bf16.mxu0 %v650_v46 }
  0xe1   : > { %653 = vmatpush1.bf16.msra.mxu0 %v652_v49 }
  0xe4   : > { %404 = vmatmul.mubr.f32.vlgmr.msra.gmra.mrb[0].mxu0 %v306_v50 }
 0x1b7   : > { %v405_v52 = vpop.f32.mrb[0].mxu0  ;;  %425 = sbr.rel (%p422_p5) target bundleno = 456 (0x1c8), region = 52 }
 0x1b8   : > { %v414_v54 = vmul.f32 %v413_v51, %v405_v52  ;;  %v407_v55 = vpop.f32.mrb[1].mxu0 }
 0x1b9   : > { %v415_v57 = vmul.f32 %v413_v51, %v407_v55 }
 0x1ba   : > { %v416_v58 = vadd.f32 %v414_v54, %v410_v53 }
 0x1bb   : > { %v417_v59 = vadd.f32 %v415_v57, %v411_v56 }
 0x1bc   : > { %418 = vst [vmem:[#allocation2] sm:$0xff] %v416_v58 }
 0x1bd   : > { %419 = vst [vmem:[#allocation2 + $0x8] sm:$0xff] %v417_v59 }
 0x1c3   : > { %v426_v1 = vld [vmem:[#allocation2] sm:$0xff] }
 0x1c4   : > { %v427_v2 = vld [vmem:[#allocation2 + $0x8] sm:$0xff]  ;;  %v440_v5 = vadd.f32 %v433_v3, %v426_v1 }
 0x1c5   : > { %v441_v6 = vadd.f32 %v437_v4, %v427_v2 }
 0x1c6   : > { %442 = vst [vmem:[%s1483_s17] sm:$0xff] %v440_v5 }
 0x1c7   : > { %443 = vst [vmem:[%s1483_s17 + $0x8] sm:$0xff] %v441_v6 }
 0x1c8 PF: > { %s1675_s24 = sld [smem:[#allocation20_spill]]  ;;  %s1676_s15 = sld [smem:[#allocation28_spill]] }
 0x1c9   : > { %s459_s28 = sshll.u32 %s1483_s17, 4  ;;  %s445_s9 = scalar_lea.sflag [#allocation7], %s1471_s29  ;;  %s460_s28 = int_to_ptr.vmem [resolvable:$true] %s459_s28 }
 0x1ca   : > { %s912_s8 = scalar_lea.vmem %s460_s28, 256  ;;  %p1677_p13 = scmp.ne.s32.totalorder %s1660_s4, 0 }
 0x1cb   : > { %p913_p3 = scmp.ne.s32.totalorder %s460_s28, %s912_s8  ;;  %s1095_s1 = smov [#allocation11]  }
 0x1cc   : > { %s916_s20 = sshll.u32 %s1095_s1, 4  ;;  %s917_s20 = int_to_ptr.vmem [resolvable:$false] %s916_s20 }
 0x1cd   : > { %p914_p0 = pnand %p913_p3, %p1677_p13  ;;  %s918_s14 = scalar_lea.vmem %s917_s20, 512 }
 0x1ce   : > { %s621_s19 = sshll.u32 %s1675_s24, 8  ;;  %p919_p7 = scmp.lt.s32.totalorder %s460_s28, %s917_s20 }
 0x1cf   : > { %s1529_s30 = scalar_lea.hbm %s1676_s15, %s621_s19  ;;  %p915_p1 = pneg %p914_p0 }
 0x1d0   : > { %p920_p8 = scmp.lt.s32.totalorder %s918_s14, %s912_s8 }
 0x1d2   : > { %p921_p10 = por %p920_p8, %p919_p7 }
 0x1d4   : > { %p922_p11 = pnand %p921_p10, %p915_p1 }
 0x1d6   : > { %925 = shalt.err (!%p922_p11)
}
 0x1d7   : > { %s926_s29 = scalar_lea.hbm %s1529_s30, 256  ;;  %s930_s24 = scalar_lea.hbm %s1676_s15, 512 }
 0x1d8   : > { %p927_p6 = scmp.ne.s32.totalorder %s1529_s30, %s926_s29  ;;  %p931_p12 = scmp.lt.u32.totalorder %s1529_s30, %s1676_s15 }
 0x1d9   : > { %p932_p2 = scmp.lt.u32.totalorder %s930_s24, %s926_s29  ;;  %p934_p3 = scmp.lt.u32.totalorder %s926_s29, %s1529_s30 }
 0x1da   : > { %p928_p4 = pnand %p927_p6, %p1677_p13 }
 0x1db   : > { %p933_p5 = por %p932_p2, %p931_p12 }
 0x1dc   : > { %p929_p9 = pneg %p928_p4 }
 0x1dd   : > { %p935_p0 = por %p934_p3, %p933_p5 }
 0x1df   : > { %p936_p1 = pnand %p935_p0, %p929_p9 }
 0x1e1   : > { %939 = shalt.err (!%p936_p1)
}
 0x1e2   : > { %660 = dma.vmem_to_hbm [thread:$0]  (%p1677_p13), %s460_s28, 256, %s1529_s30, %s445_s9  }
 0x1e3 PF: > { %p677_p7 = scmp.ge.s32.totalorder %s1084_s13, 2  ;;  %s471_s18 = sand.u32 1, %s1024_s25  }
 0x1e4   : > { %p1678_p8 = scmp.ne.s32.totalorder %s1661_s16, 0  ;;  %s472_s8 = scalar_lea.sflag [#allocation7], %s471_s18 }
 0x1e6   : > { %p673_p10 = pnand %p677_p7, %p1678_p8 }
 0x1e8   : > { %1019 = dma.done.wait (!%p673_p10), %s472_s8, 256  }
 0x1e9   : > { %1021 = vsyncadd (!%p673_p10), %s472_s8, 4294967040  ;;  %s27_s13 = sadd.s32 1, %s1084_s13   ;;  %s1680_s28 = sld [smem:[#allocation17_spill]] }
 0x1ea   : > { %p1555_p11 = scmp.ge.s32.totalorder %s27_s13, 14   ;;  %s1681_s4 = sld [smem:[#allocation21_spill]] }
 0x1eb   : > { %s1682_s16 = sld [smem:[#allocation24_spill]]  ;;  %s1683_s20 = sld [smem:[#allocation25_spill]] }
 0x1ec   : > { %s1684_s25 = smov %s1028_s26  ;;  %s1685_s26 = smov %s1032_s27 }
 0x1ed   : > { %s1686_s27 = smov %s1390_s23  ;;  %s1687_s29 = smov %s1044_s0 }
 0x1ee   : > { %s1688_s0 = smov %s1355_s2  ;;  %s1689_s30 = smov %s1052_s5 }
 0x1ef   : > { %s1690_s5 = smov %s1056_s6  ;;  %s1691_s6 = smov %s1326_s22 }
 0x1f0   : > { %s1692_s7 = smov %s1072_s10  ;;  %s1693_s8 = smov %s1076_s11 }
 0x1f1   : > { %s1694_s9 = smov %s1080_s12  ;;  %s1695_s10 = smov %s1681_s4 }
 0x1f2   : > { %s1696_s11 = smov %s1682_s16  ;;  %s1697_s12 = smov %s1683_s20 }
 0x1f3   :  { %26 = sbr.rel (!%p1555_p11) target bundleno = 26 (0x1a), region = 109 }
 0x1fa   :  { %477 = vsyncpa [#allocation6], 1 }
 0x1fb   :  { %479 = vsyncpa [#allocation6 + $0x1], 1 }
 0x1fc   :  { %480 = vsyncpa [#allocation9], 1 }
 0x1fd   :  { %482 = vsyncpa [#allocation9 + $0x1], 1 }
 0x1fe   :  { %483 = vsyncpa [#allocation7], 1 }
 0x1ff   :  { %485 = vsyncpa [#allocation7 + $0x1], 1 }

</bundles_post_ra>
